<compile_context>
chip_gen: v7x
topology: tpu7x:2x2x1
jax: 0.10.0
libtpu: 0.0.40
codegen_flags: <defaults>
</compile_context>

<pallas_src>
import functools

import jax
import jax.numpy as jnp
from jax.experimental import pallas as pl
from jax.experimental.pallas import tpu as pltpu


def _round_up(x, m):
    return (x + m - 1) // m * m


def _mlp_kernel(x_ref, w1_ref, b1_ref, w2_ref, b2_ref, w3_ref, b3_ref, o_ref):
    # One batch tile per grid step: three MXU matmuls + VPU bias/relu.
    # Weights/biases use constant index_maps -> DMA'd once, VMEM-resident.
    x = x_ref[...]
    h1 = jnp.dot(x, w1_ref[...], preferred_element_type=jnp.float32) + b1_ref[...]
    h1 = jnp.maximum(h1, 0.0)
    h2 = jnp.dot(h1, w2_ref[...], preferred_element_type=jnp.float32) + b2_ref[...]
    h2 = jnp.maximum(h2, 0.0)
    out = jnp.dot(h2, w3_ref[...], preferred_element_type=jnp.float32) + b3_ref[...]
    o_ref[...] = out.astype(o_ref.dtype)


def _choose_tb(B, block_b):
    """Batch tile: sublane-aligned, <= block_b, and >= 2 grid steps when B >= 16
    so the two v7x TensorCores both get work."""
    tb = min(block_b, _round_up(B, 8))
    if B >= 16:
        tb = min(tb, _round_up(pl.cdiv(B, 2), 8))
    return max(tb, 8)


@functools.partial(jax.jit, static_argnames=("block_b",))
def net_forward(x, padded_params, block_b=1024):
    """x: [B, n_input] float32; padded_params: output of pad_params()."""
    w1p, b1p, w2p, b2p, w3p, b3p = (
        padded_params[k] for k in ("w1", "b1", "w2", "b2", "w3", "b3")
    )
    B, n_input = x.shape
    H1P = w1p.shape[1]          # 50 padded to 128
    H2P = w2p.shape[1]          # 200 padded to 256
    n_output = w3p.shape[1]     # true output width (NOT padded)

    TB = _choose_tb(B, block_b)
    grid = (pl.cdiv(B, TB),)    # partial last block handled/masked by Pallas

    def _const(i):  # weights/biases: same block every step -> fetched once
        return (0, 0)

    # Rough VMEM footprint (double-buffered x/out/weights + h1/h2 temporaries).
    vmem_est = 4 * (
        2 * TB * n_input
        + 2 * TB * n_output
        + 2 * (n_input * H1P + H1P * H2P + H2P * n_output + H1P + H2P + n_output)
        + TB * (H1P + H2P)
    )
    vmem_limit = int(min(max(8 * 1024 * 1024, 2 * vmem_est), 100 * 1024 * 1024))

    out = pl.pallas_call(
        _mlp_kernel,
        out_shape=jax.ShapeDtypeStruct((B, n_output), jnp.float32),
        grid=grid,
        in_specs=[
            pl.BlockSpec((TB, n_input), lambda i: (i, 0)),
            pl.BlockSpec((n_input, H1P), _const),
            pl.BlockSpec((1, H1P), _const),
            pl.BlockSpec((H1P, H2P), _const),
            pl.BlockSpec((1, H2P), _const),
            pl.BlockSpec((H2P, n_output), _const),
            pl.BlockSpec((1, n_output), _const),
        ],
        out_specs=pl.BlockSpec((TB, n_output), lambda i: (i, 0)),
        compiler_params=pltpu.CompilerParams(
            dimension_semantics=("parallel",),
            vmem_limit_bytes=vmem_limit,
        ),
    )(x, w1p, b1p, w2p, b2p, w3p, b3p)

    return out


def init_params(key, n_input, n_output):
    """Deterministic init mimicking torch.nn.Linear default (uniform +-1/sqrt(fan_in)).
    Weights stored as [in, out] (transpose of torch's [out, in])."""
    ks = jax.random.split(key, 6)

    def linear(kw, kb, fan_in, fan_out):
        bound = 1.0 / jnp.sqrt(jnp.float32(fan_in))
        w = jax.random.uniform(kw, (fan_in, fan_out), jnp.float32, -bound, bound)
        b = jax.random.uniform(kb, (1, fan_out), jnp.float32, -bound, bound)
        return w, b

    w1, b1 = linear(ks[0], ks[1], n_input, 50)
    w2, b2 = linear(ks[2], ks[3], 50, 200)
    w3, b3 = linear(ks[4], ks[5], 200, n_output)
    return {"w1": w1, "b1": b1, "w2": w2, "b2": b2, "w3": w3, "b3": b3}


def pad_params(params):
    """One-time padding of hidden dims to MXU-friendly 128-multiples (exact:
    padded weight rows/cols are zero, ReLU(0)=0). Output dim is left unpadded."""
    w1, b1, w2, b2, w3, b3 = (params[k] for k in ("w1", "b1", "w2", "b2", "w3", "b3"))
    h1, h2 = w1.shape[1], w2.shape[1]
    H1P, H2P = _round_up(h1, 128), _round_up(h2, 128)
    return {
        "w1": jnp.pad(w1, ((0, 0), (0, H1P - h1))),
        "b1": jnp.pad(b1, ((0, 0), (0, H1P - h1))),
        "w2": jnp.pad(w2, ((0, H1P - h1), (0, H2P - h2))),
        "b2": jnp.pad(b2, ((0, 0), (0, H2P - h2))),
        "w3": jnp.pad(w3, ((0, H2P - h2), (0, 0))),
        "b3": b3,
    }


def net_forward_ref(x, p):
    h1 = jnp.maximum(x @ p["w1"] + p["b1"], 0.0)
    h2 = jnp.maximum(h1 @ p["w2"] + p["b2"], 0.0)
    return h2 @ p["w3"] + p["b3"]


if __name__ == "__main__":
    n_input, n_output = 32, 16
    key = jax.random.PRNGKey(0)
    kx, kp, kx2 = jax.random.split(key, 3)
    params = init_params(kp, n_input, n_output)
    padded = pad_params(params)  # padded once, reused across calls

    # Small-batch case (matches the original module usage).
    B = 8
    x = jax.random.normal(kx, (B, n_input), jnp.float32)
    out = jax.block_until_ready(net_forward(x, padded))
    ref = net_forward_ref(x, params)
    assert out.shape == (B, n_output), out.shape
    assert jnp.allclose(out, ref, atol=1e-4, rtol=1e-4), "mismatch vs reference (B=8)"

    # Larger, non-divisible batch: exercises the partial (masked) final block
    # and the >=2-step grid (megacore split) with no wrapper pad/slice.
    B2 = 300
    x2 = jax.random.normal(kx2, (B2, n_input), jnp.float32)
    out2 = jax.block_until_ready(net_forward(x2, padded, block_b=128))
    ref2 = net_forward_ref(x2, params)
    assert out2.shape == (B2, n_output), out2.shape
    assert jnp.allclose(out2, ref2, atol=1e-4, rtol=1e-4), "mismatch vs reference (B=300)"

    print("KERNEL_OK")
</pallas_src>

<mosaic_0001>
module attributes {stable_mosaic.version = 11 : i64} {
  func.func @_mlp_kernel(%arg0: i32, %arg1: memref<8x32xf32, #tpu.memory_space<vmem>>, %arg2: memref<32x128xf32, #tpu.memory_space<vmem>>, %arg3: memref<1x128xf32, #tpu.memory_space<vmem>>, %arg4: memref<128x256xf32, #tpu.memory_space<vmem>>, %arg5: memref<1x256xf32, #tpu.memory_space<vmem>>, %arg6: memref<256x16xf32, #tpu.memory_space<vmem>>, %arg7: memref<1x16xf32, #tpu.memory_space<vmem>>, %arg8: memref<8x16xf32, #tpu.memory_space<vmem>>) attributes {dimension_semantics = [#tpu.dimension_semantics<parallel>], iteration_bounds = array<i64: 1>, scalar_prefetch = 0 : i64, scratch_operands = 0 : i64, tpu.core_type = #tpu.core_type<tc>, window_params = [{transform_indices = @transform_0, window_bounds = array<i64: 8, 32>}, {pipeline_mode = #tpu.pipeline_mode<synchronous>, transform_indices = @transform_1, window_bounds = array<i64: 32, 128>}, {pipeline_mode = #tpu.pipeline_mode<synchronous>, transform_indices = @transform_2, window_bounds = array<i64: 1, 128>}, {pipeline_mode = #tpu.pipeline_mode<synchronous>, transform_indices = @transform_3, window_bounds = array<i64: 128, 256>}, {pipeline_mode = #tpu.pipeline_mode<synchronous>, transform_indices = @transform_4, window_bounds = array<i64: 1, 256>}, {pipeline_mode = #tpu.pipeline_mode<synchronous>, transform_indices = @transform_5, window_bounds = array<i64: 256, 16>}, {pipeline_mode = #tpu.pipeline_mode<synchronous>, transform_indices = @transform_6, window_bounds = array<i64: 1, 16>}, {transform_indices = @transform_7, window_bounds = array<i64: 8, 16>}]} {
    %c0 = arith.constant 0 : index
    %c0_0 = arith.constant 0 : index
    %0 = vector.load %arg1[%c0, %c0_0] : memref<8x32xf32, #tpu.memory_space<vmem>>, vector<8x32xf32>
    %c0_1 = arith.constant 0 : index
    %c0_2 = arith.constant 0 : index
    %1 = vector.load %arg2[%c0_1, %c0_2] : memref<32x128xf32, #tpu.memory_space<vmem>>, vector<32x128xf32>
    %cst = arith.constant dense<0.000000e+00> : vector<8x128xf32>
    %2 = tpu.matmul %0, %1, %cst {dimension_numbers = #tpu.dot_dimension_numbers<[1], [0], [0], [1], [0, 0, 1, 1], [], []>} : vector<8x32xf32>, vector<32x128xf32>, vector<8x128xf32> -> vector<8x128xf32>
    %c0_3 = arith.constant 0 : index
    %c0_4 = arith.constant 0 : index
    %3 = vector.load %arg3[%c0_3, %c0_4] : memref<1x128xf32, #tpu.memory_space<vmem>>, vector<1x128xf32>
    %4 = vector.broadcast %3 : vector<1x128xf32> to vector<8x128xf32>
    %5 = arith.addf %2, %4 : vector<8x128xf32>
    %cst_5 = arith.constant 0.000000e+00 : f32
    %6 = vector.broadcast %cst_5 : f32 to vector<8x128xf32>
    %7 = arith.maximumf %5, %6 : vector<8x128xf32>
    %c0_6 = arith.constant 0 : index
    %c0_7 = arith.constant 0 : index
    %8 = vector.load %arg4[%c0_6, %c0_7] : memref<128x256xf32, #tpu.memory_space<vmem>>, vector<128x256xf32>
    %cst_8 = arith.constant dense<0.000000e+00> : vector<8x256xf32>
    %9 = tpu.matmul %7, %8, %cst_8 {dimension_numbers = #tpu.dot_dimension_numbers<[1], [0], [0], [1], [0, 0, 1, 1], [], []>} : vector<8x128xf32>, vector<128x256xf32>, vector<8x256xf32> -> vector<8x256xf32>
    %c0_9 = arith.constant 0 : index
    %c0_10 = arith.constant 0 : index
    %10 = vector.load %arg5[%c0_9, %c0_10] : memref<1x256xf32, #tpu.memory_space<vmem>>, vector<1x256xf32>
    %11 = vector.broadcast %10 : vector<1x256xf32> to vector<8x256xf32>
    %12 = arith.addf %9, %11 : vector<8x256xf32>
    %cst_11 = arith.constant 0.000000e+00 : f32
    %13 = vector.broadcast %cst_11 : f32 to vector<8x256xf32>
    %14 = arith.maximumf %12, %13 : vector<8x256xf32>
    %c0_12 = arith.constant 0 : index
    %c0_13 = arith.constant 0 : index
    %15 = vector.load %arg6[%c0_12, %c0_13] : memref<256x16xf32, #tpu.memory_space<vmem>>, vector<256x16xf32>
    %cst_14 = arith.constant dense<0.000000e+00> : vector<8x16xf32>
    %16 = tpu.matmul %14, %15, %cst_14 {dimension_numbers = #tpu.dot_dimension_numbers<[1], [0], [0], [1], [0, 0, 1, 1], [], []>} : vector<8x256xf32>, vector<256x16xf32>, vector<8x16xf32> -> vector<8x16xf32>
    %c0_15 = arith.constant 0 : index
    %c0_16 = arith.constant 0 : index
    %17 = vector.load %arg7[%c0_15, %c0_16] : memref<1x16xf32, #tpu.memory_space<vmem>>, vector<1x16xf32>
    %18 = vector.broadcast %17 : vector<1x16xf32> to vector<8x16xf32>
    %19 = arith.addf %16, %18 : vector<8x16xf32>
    %c0_17 = arith.constant 0 : index
    %c0_18 = arith.constant 0 : index
    %20 = vector.load %arg8[%c0_17, %c0_18] : memref<8x16xf32, #tpu.memory_space<vmem>>, vector<8x16xf32>
    tpu.vector_store %arg8[%c0_17, %c0_18], %19 {strides = array<i32>} : memref<8x16xf32, #tpu.memory_space<vmem>>, vector<8x16xf32>,
    return
  }
  func.func @transform_0(%arg0: i32) -> (i32, i32) {
    %c0_i32 = arith.constant 0 : i32
    %c0_i32_0 = arith.constant 0 : i32
    return %arg0, %c0_i32 : i32, i32
  }
  func.func @transform_1(%arg0: i32) -> (i32, i32) {
    %c0_i32 = arith.constant 0 : i32
    %c0_i32_0 = arith.constant 0 : i32
    %c0_i32_1 = arith.constant 0 : i32
    return %c0_i32, %c0_i32_0 : i32, i32
  }
  func.func @transform_2(%arg0: i32) -> (i32, i32) {
    %c0_i32 = arith.constant 0 : i32
    %c0_i32_0 = arith.constant 0 : i32
    %c0_i32_1 = arith.constant 0 : i32
    return %c0_i32, %c0_i32_0 : i32, i32
  }
  func.func @transform_3(%arg0: i32) -> (i32, i32) {
    %c0_i32 = arith.constant 0 : i32
    %c0_i32_0 = arith.constant 0 : i32
    %c0_i32_1 = arith.constant 0 : i32
    return %c0_i32, %c0_i32_0 : i32, i32
  }
  func.func @transform_4(%arg0: i32) -> (i32, i32) {
    %c0_i32 = arith.constant 0 : i32
    %c0_i32_0 = arith.constant 0 : i32
    %c0_i32_1 = arith.constant 0 : i32
    return %c0_i32, %c0_i32_0 : i32, i32
  }
  func.func @transform_5(%arg0: i32) -> (i32, i32) {
    %c0_i32 = arith.constant 0 : i32
    %c0_i32_0 = arith.constant 0 : i32
    %c0_i32_1 = arith.constant 0 : i32
    return %c0_i32, %c0_i32_0 : i32, i32
  }
  func.func @transform_6(%arg0: i32) -> (i32, i32) {
    %c0_i32 = arith.constant 0 : i32
    %c0_i32_0 = arith.constant 0 : i32
    %c0_i32_1 = arith.constant 0 : i32
    return %c0_i32, %c0_i32_0 : i32, i32
  }
  func.func @transform_7(%arg0: i32) -> (i32, i32) {
    %c0_i32 = arith.constant 0 : i32
    %c0_i32_0 = arith.constant 0 : i32
    return %arg0, %c0_i32 : i32, i32
  }
}

</mosaic_0001>

<bundles_post_ra>
// kernel: net_forward.1
= control target key start
LH: loop header
LB: loop body
LE: loop exit
PB: predicated region body
PF: predicated region fallthrough
CT: control target
= control target key end

     0   :  { %v508_v3 = vmov 0.0|0.0   ;;  %vm509_vm0 = vmmov 0   ;;  %v510_v6 = vmov 0.0   ;;  %vm39_vm1 = vcmask 261120   ;;  %s780_s0 = inlined_call_operand.vmem [shape: f32[8,32], index: 0, kind: input, shape index: {}]   ;;  %s781_s1 = inlined_call_operand.vmem [shape: f32[32,128], index: 1, kind: input, shape index: {}]   ;;  %s782_s2 = inlined_call_operand.vmem [shape: f32[1,128], index: 2, kind: input, shape index: {}]   ;;  %s783_s3 = inlined_call_operand.vmem [shape: f32[128,256], index: 3, kind: input, shape index: {}]   ;;  %s784_s4 = inlined_call_operand.vmem [shape: f32[1,256], index: 4, kind: input, shape index: {}]   ;;  %s785_s5 = inlined_call_operand.vmem [shape: f32[256,16], index: 5, kind: input, shape index: {}]   ;;  %s786_s6 = inlined_call_operand.vmem [shape: f32[1,16], index: 6, kind: input, shape index: {}]   ;;  %s787_s7 = inlined_call_operand.hbm [shape: f32[8,16], index: 7, kind: output, shape index: {}]  }
   0x1   :  { %v28_v0 = vld [vmem:[%s781_s1] sm:$0xff]  ;;  %v29_v1 = vld [vmem:[%s781_s1 + $0x8] sm:$0xff]  ;;  %v30_v2 = vld [vmem:[%s781_s1 + $0x10] sm:$0xff]  ;;  %410 = vmatprep.subr.bf16.mxu0 %v508_v3  ;;  %407 = vmatprep.mubr.msk.f32.mxu0 %vm509_vm0, %v510_v6 }
   0x2   :  { %v411_v4 = vpack.c.bf16 %v29_v1, %v28_v0  ;;  %v31_v5 = vld [vmem:[%s781_s1 + $0x18] sm:$0xff]  ;;  %v115_v7 = vld [vmem:[%s783_s3 + $0x8] sm:$0xff]  ;;  %v114_v9 = vld [vmem:[%s783_s3] sm:$0xff]  ;;  %222 = vmatprep.mubr.f32.mxu1 %v510_v6 }
   0x3   :  { %v117_v8 = vld [vmem:[%s783_s3 + $0x18] sm:$0xff]  ;;  %v116_v10 = vld [vmem:[%s783_s3 + $0x10] sm:$0xff]  ;;  %v414_v11 = vpack.c.bf16 %v31_v5, %v30_v2  ;;  %v119_v14 = vld [vmem:[%s783_s3 + $0x28] sm:$0xff] }
   0x4   :  { %412 = vmatpush3.bf16.msra.mxu0 %v411_v4  ;;  %v416_v12 = vpack.c.bf16 %v117_v8, %v115_v7  ;;  %v418_v13 = vpack.c.bf16 %v116_v10, %v114_v9  ;;  %v121_v15 = vld [vmem:[%s783_s3 + $0x38] sm:$0xff]  ;;  %v118_v16 = vld [vmem:[%s783_s3 + $0x20] sm:$0xff]  ;;  %v120_v18 = vld [vmem:[%s783_s3 + $0x30] sm:$0xff] }
   0x5   :  { %413 = vmatprep.subr.bf16.mxu0 %v508_v3  ;;  %v420_v17 = vpack.c.bf16 %v121_v15, %v119_v14  ;;  %v123_v19 = vld [vmem:[%s783_s3 + $0x48] sm:$0xff]  ;;  %v125_v20 = vld [vmem:[%s783_s3 + $0x58] sm:$0xff]  ;;  %v422_v21 = vpack.c.bf16 %v120_v18, %v118_v16  ;;  %v27_v22 = vld [vmem:[%s780_s0] sm:$0xff] }
   0x6   :  { %417 = vmatprep.subr.bf16.mxu1 %v416_v12  ;;  %v424_v23 = vpack.c.bf16 %v125_v20, %v123_v19  ;;  %v122_v24 = vld [vmem:[%s783_s3 + $0x40] sm:$0xff]  ;;  %v124_v25 = vld [vmem:[%s783_s3 + $0x50] sm:$0xff]  ;;  %v127_v26 = vld [vmem:[%s783_s3 + $0x68] sm:$0xff] }
   0x7   :  { %419 = vmatpush1.bf16.msra.mxu1 %v418_v13  ;;  %v129_v27 = vld [vmem:[%s783_s3 + $0x78] sm:$0xff]  ;;  %v426_v28 = vpack.c.bf16 %v124_v25, %v122_v24  ;;  %v126_v30 = vld [vmem:[%s783_s3 + $0x60] sm:$0xff]  ;;  %v128_v31 = vld [vmem:[%s783_s3 + $0x70] sm:$0xff] }
   0x8   :  { %415 = vmatpush3.bf16.msra.mxu0 %v414_v11  ;;  %421 = vmatprep.subr.bf16.mxu1 %v420_v17  ;;  %v428_v29 = vpack.c.bf16 %v129_v27, %v127_v26 }
   0xb   :  { %408 = vmatmul.mubr.msk.f32.vlgmr.msra.gmra.mrb[0].mxu0 %vm39_vm1, %v27_v22  ;;  %423 = vmatpush1.bf16.msra.mxu1 %v422_v21 }
   0xc   :  { %425 = vmatprep.subr.bf16.mxu1 %v424_v23 }
   0xd   :  { %12 = vsyncpa [#allocation3], 0  ;;  %v131_v32 = vld [vmem:[%s783_s3 + $0x88] sm:$0xff]  ;;  %v133_v33 = vld [vmem:[%s783_s3 + $0x98] sm:$0xff]  ;;  %v430_v34 = vpack.c.bf16 %v128_v31, %v126_v30  ;;  %s511_s15 = smov [#allocation2]   ;;  %vm340_vm2 = vcmask 130048  }
   0xe   :  { %v432_v35 = vpack.c.bf16 %v133_v33, %v131_v32  ;;  %v130_v36 = vld [vmem:[%s783_s3 + $0x80] sm:$0xff]  ;;  %v132_v37 = vld [vmem:[%s783_s3 + $0x90] sm:$0xff]  ;;  %v135_v38 = vld [vmem:[%s783_s3 + $0xa8] sm:$0xff]  ;;  %s348_s16 = sshll.u32 %s511_s15, 4  ;;  %s349_s16 = int_to_ptr.vmem [resolvable:$true] %s348_s16 }
   0xf   :  { %427 = vmatpush1.bf16.msra.mxu1 %v426_v28  ;;  %v137_v39 = vld [vmem:[%s783_s3 + $0xb8] sm:$0xff]  ;;  %v434_v40 = vpack.c.bf16 %v132_v37, %v130_v36  ;;  %v134_v42 = vld [vmem:[%s783_s3 + $0xa0] sm:$0xff]  ;;  %v136_v43 = vld [vmem:[%s783_s3 + $0xb0] sm:$0xff]  ;;  %p489_p1 = scmp.lt.s32.totalorder %s349_s16, %s349_s16 }
  0x10   :  { %429 = vmatprep.subr.bf16.mxu1 %v428_v29  ;;  %v436_v41 = vpack.c.bf16 %v137_v39, %v135_v38  ;;  %v139_v44 = vld [vmem:[%s783_s3 + $0xc8] sm:$0xff]  ;;  %v141_v45 = vld [vmem:[%s783_s3 + $0xd8] sm:$0xff]  ;;  %v438_v46 = vpack.c.bf16 %v136_v43, %v134_v42  ;;  %v138_v48 = vld [vmem:[%s783_s3 + $0xc0] sm:$0xff] }
  0x11   :  { %v440_v47 = vpack.c.bf16 %v141_v45, %v139_v44  ;;  %v140_v49 = vld [vmem:[%s783_s3 + $0xd0] sm:$0xff]  ;;  %v143_v51 = vld [vmem:[%s783_s3 + $0xe8] sm:$0xff]  ;;  %v145_v52 = vld [vmem:[%s783_s3 + $0xf8] sm:$0xff] }
  0x12   :  { %v442_v50 = vpack.c.bf16 %v140_v49, %v138_v48  ;;  %v444_v53 = vpack.c.bf16 %v145_v52, %v143_v51  ;;  %v142_v54 = vld [vmem:[%s783_s3 + $0xe0] sm:$0xff]  ;;  %v144_v55 = vld [vmem:[%s783_s3 + $0xf0] sm:$0xff]  ;;  %v248_v58 = vld [vmem:[%s785_s5 + $0x88] sm:$0xff] }
  0x13   :  { %431 = vmatpush1.bf16.msra.mxu1 %v430_v34  ;;  %v446_v56 = vpack.c.bf16 %v144_v55, %v142_v54  ;;  %v247_v57 = vld [vmem:[%s785_s5 + $0x80] sm:$0xff]  ;;  %v232_v61 = vld [vmem:[%s785_s5 + $0x8] sm:$0xff]  ;;  %v249_v62 = vld [vmem:[%s785_s5 + $0x90] sm:$0xff] }
  0x14   :  { %433 = vmatprep.subr.bf16.mxu1 %v432_v35  ;;  %v231_v59 = vld [vmem:[%s785_s5] sm:$0xff]  ;;  %v448_v60 = vpack.c.bf16 %v248_v58, %v247_v57  ;;  %v250_v63 = vld [vmem:[%s785_s5 + $0x98] sm:$0xff]  ;;  %v233_v2 = vld [vmem:[%s785_s5 + $0x10] sm:$0xff] }
  0x15   :  { %v450_v0 = vpack.c.bf16 %v232_v61, %v231_v59  ;;  %v452_v1 = vpack.c.bf16 %v250_v63, %v249_v62  ;;  %v234_v3 = vld [vmem:[%s785_s5 + $0x18] sm:$0xff]  ;;  %v251_v4 = vld [vmem:[%s785_s5 + $0xa0] sm:$0xff]  ;;  %v252_v5 = vld [vmem:[%s785_s5 + $0xa8] sm:$0xff] }
  0x16   :  { %449 = vmatprep.subr.bf16.mxu0 %v448_v60  ;;  %v454_v6 = vpack.c.bf16 %v234_v3, %v233_v2  ;;  %v456_v7 = vpack.c.bf16 %v252_v5, %v251_v4  ;;  %v235_v8 = vld [vmem:[%s785_s5 + $0x20] sm:$0xff]  ;;  %v236_v9 = vld [vmem:[%s785_s5 + $0x28] sm:$0xff]  ;;  %v253_v10 = vld [vmem:[%s785_s5 + $0xb0] sm:$0xff] }
  0x17   :  { %435 = vmatpush1.bf16.msra.mxu1 %v434_v40  ;;  %451 = vmatpush3.bf16.msra.mxu0 %v450_v0  ;;  %v254_v11 = vld [vmem:[%s785_s5 + $0xb8] sm:$0xff]  ;;  %v458_v12 = vpack.c.bf16 %v236_v9, %v235_v8  ;;  %v237_v14 = vld [vmem:[%s785_s5 + $0x30] sm:$0xff]  ;;  %v255_v16 = vld [vmem:[%s785_s5 + $0xc0] sm:$0xff] }
  0x18   :  { %437 = vmatprep.subr.bf16.mxu1 %v436_v41  ;;  %453 = vmatprep.subr.bf16.mxu0 %v452_v1  ;;  %v460_v13 = vpack.c.bf16 %v254_v11, %v253_v10  ;;  %v238_v15 = vld [vmem:[%s785_s5 + $0x38] sm:$0xff]  ;;  %v256_v17 = vld [vmem:[%s785_s5 + $0xc8] sm:$0xff]  ;;  %v239_v20 = vld [vmem:[%s785_s5 + $0x40] sm:$0xff] }
  0x19   :  { %v462_v18 = vpack.c.bf16 %v238_v15, %v237_v14  ;;  %v464_v19 = vpack.c.bf16 %v256_v17, %v255_v16  ;;  %v240_v21 = vld [vmem:[%s785_s5 + $0x48] sm:$0xff]  ;;  %v257_v22 = vld [vmem:[%s785_s5 + $0xd0] sm:$0xff]  ;;  %v258_v23 = vld [vmem:[%s785_s5 + $0xd8] sm:$0xff] }
  0x1a   :  { %v466_v24 = vpack.c.bf16 %v240_v21, %v239_v20  ;;  %v468_v25 = vpack.c.bf16 %v258_v23, %v257_v22  ;;  %v241_v26 = vld [vmem:[%s785_s5 + $0x50] sm:$0xff]  ;;  %v242_v27 = vld [vmem:[%s785_s5 + $0x58] sm:$0xff]  ;;  %v259_v28 = vld [vmem:[%s785_s5 + $0xe0] sm:$0xff] }
  0x1b   :  { %439 = vmatpush1.bf16.msra.mxu1 %v438_v46  ;;  %455 = vmatpush3.bf16.msra.mxu0 %v454_v6  ;;  %v260_v29 = vld [vmem:[%s785_s5 + $0xe8] sm:$0xff]  ;;  %v470_v30 = vpack.c.bf16 %v242_v27, %v241_v26  ;;  %v356_v32 = vld [vmem:[%s782_s2] ss:$0 sm:$0xff]  ;;  %v261_v40 = vld [vmem:[%s785_s5 + $0xf0] sm:$0xff]  ;;  %v148_v46 = vlaneseq }
  0x1c   :  { %441 = vmatprep.subr.bf16.mxu1 %v440_v47  ;;  %457 = vmatprep.subr.bf16.mxu0 %v456_v7  ;;  %v472_v31 = vpack.c.bf16 %v260_v29, %v259_v28  ;;  %v243_v37 = vld [vmem:[%s785_s5 + $0x60] sm:$0xff]  ;;  %v244_v38 = vld [vmem:[%s785_s5 + $0x68] sm:$0xff]  ;;  %v262_v41 = vld [vmem:[%s785_s5 + $0xf8] sm:$0xff] }
  0x1d   :  { %v474_v39 = vpack.c.bf16 %v244_v38, %v243_v37  ;;  %v476_v42 = vpack.c.bf16 %v262_v41, %v261_v40  ;;  %v245_v43 = vld [vmem:[%s785_s5 + $0x70] sm:$0xff]  ;;  %v246_v44 = vld [vmem:[%s785_s5 + $0x78] sm:$0xff]  ;;  %v149_v47 = vshrl.u32 %v148_v46, 7  ;;  %v146_v49 = vld [vmem:[%s784_s4] sm:$0x3]  ;;  %s484_s4 = scalar_lea.vmem %s349_s16, 128 }
  0x1e   :  { %v478_v45 = vpack.c.bf16 %v246_v44, %v245_v43  ;;  %v358_v60 = vld [vmem:[%s786_s6] ss:$0 sm:$0xff]  ;;  %p485_p0 = scmp.ne.s32.totalorder %s349_s16, %s484_s4  ;;  %p490_p2 = scmp.lt.s32.totalorder %s484_s4, %s484_s4 }
  0x1f   :  { %443 = vmatpush1.bf16.msra.mxu1 %v442_v50  ;;  %459 = vmatpush3.bf16.msra.mxu0 %v458_v12  ;;  %v150_v48 = vsub.s32 0, %v149_v47  ;;  %v154_v50 = vsub.s32 1, %v149_v47 }
  0x20   :  { %445 = vmatprep.subr.bf16.mxu1 %v444_v53  ;;  %461 = vmatprep.subr.bf16.mxu0 %v460_v13  ;;  %p491_p3 = por %p490_p2, %p489_p1 }
  0x21   :  { %v151_v51 = vrot.slane %v146_v49, %v150_v48  ;;  %v155_v52 = vrot.slane %v146_v49, %v154_v50 }
  0x22   :  { %p492_p4 = pnand %p491_p3, %p485_p0 }
  0x23   :  { %447 = vmatpush1.bf16.msra.mxu1 %v446_v56  ;;  %463 = vmatpush3.bf16.msra.mxu0 %v462_v18 }
  0x24   :  { %465 = vmatprep.subr.bf16.mxu0 %v464_v19 }
  0x27   :  { %467 = vmatpush3.bf16.msra.mxu0 %v466_v24 }
  0x28   :  { %469 = vmatprep.subr.bf16.mxu0 %v468_v25 }
  0x2b   :  { %471 = vmatpush3.bf16.msra.mxu0 %v470_v30 }
  0x2c   :  { %473 = vmatprep.subr.bf16.mxu0 %v472_v31 }
  0x2f   :  { %475 = vmatpush3.bf16.msra.mxu0 %v474_v39 }
  0x30   :  { %477 = vmatprep.subr.bf16.mxu0 %v476_v42 }
  0x33   :  { %479 = vmatpush3.bf16.msra.mxu0 %v478_v45 }
  0xde   :  { %v109_v33 = vpop.f32.mrb[0].mxu0 }
  0xdf   :  { %v110_v34 = vadd.f32 %v356_v32, %v109_v33  ;;  %v409_v35 = vpop.f32.mrb[1].mxu0 }
  0xe1   :  { %v113_v36 = vmax.f32 %v110_v34, 0.0 }
  0xe3   :  { %223 = vmatmul.mubr.f32.vlgmr.msra.gmra.mrb[0].mxu1 %v113_v36 }
 0x1b6   :  { %v224_v53 = vpop.f32.mrb[0].mxu1 }
 0x1b7   :  { %v225_v54 = vadd.f32 %v224_v53, %v151_v51  ;;  %v226_v55 = vpop.f32.mrb[1].mxu1 }
 0x1b8   :  { %v227_v56 = vadd.f32 %v226_v55, %v155_v52 }
 0x1b9   :  { %v229_v58 = vmax.f32 %v225_v54, 0.0 }
 0x1ba   :  { %v230_v57 = vmax.f32 %v227_v56, 0.0 }
 0x1bc   :  { %334 = vmatprep.mubr.f32.mxu0 %v230_v57 }
 0x1bd   :  { %335 = vmatmul.mubr.f32.vlgmr.msra.gmra.mrb[2].mxu0 %v229_v58 }
 0x290   :  { %v396_v59 = vpop.f32.mrb[2].mxu0 }
 0x291   :  { %v397_v61 = vpop.f32.mrb[3].mxu0 }
 0x292   :  { %v398_v62 = vadd.f32 %v397_v61, %v396_v59 }
 0x294   :  { %v337_v63 = vadd.f32 %v398_v62, %v358_v60 }
 0x296   :  { %341 = vst.msk [vmem:[#allocation2] sm:$0xff] %vm340_vm2, %v337_v63 }
 0x297   :  { %495 = shalt.err (!%p492_p4)
}
 0x298   :  { %s496_s18 = scalar_lea.hbm %s787_s7, 128 }
 0x299   :  { %p497_p5 = scmp.ne.s32.totalorder %s787_s7, %s496_s18  ;;  %p500_p6 = scmp.lt.u32.totalorder %s496_s18, %s787_s7 }
 0x29b   :  { %p502_p7 = pnand %p500_p6, %p497_p5 }
 0x29d   :  { %505 = shalt.err (!%p502_p7)
}
 0x29e   :  { %351 = dma.vmem_to_hbm [thread:$0]  %s349_s16, 128, %s787_s7, [#allocation3]  }
 0x29f   :  { %506 = dma.done.wait [#allocation3], 128  }
 0x2a0   :  { %507 = vsyncadd [#allocation3], 4294967168 }
 0x2a1   :  { %355 = vsyncpa [#allocation3], 1 }

</bundles_post_ra>
